<compile_context>
chip_gen: v7x
topology: tpu7x:2x2x1
jax: 0.10.0
libtpu: 0.0.40
codegen_flags: <defaults>
</compile_context>

<pallas_src>
import jax
import jax.numpy as jnp
from jax.experimental import pallas as pl
from jax.experimental.pallas import tpu as pltpu

C_IN = 16
NEG_SLOPE = -0.484


def convt_fused_kernel(w_ref, x_ref, o_ref):
    # w_ref: SMEM (C,) f32 scalars (scalar prefetch)
    # x_ref: VMEM (1, C, H, W) block for one batch element
    # o_ref: VMEM (1, H_out, W_out) block for one batch element
    C = x_ref.shape[1]
    H, W = x_ref.shape[2], x_ref.shape[3]
    H_out, W_out = o_ref.shape[1], o_ref.shape[2]

    # Channel contraction, unrolled over the 16 channels (VPU, scalar * tile FMAs).
    acc = x_ref[0, 0] * w_ref[0]
    for c in range(1, C):
        acc = acc + x_ref[0, c] * w_ref[c]

    # z12 = where(z > 0, z, z * -0.484)
    act = jnp.where(acc > 0, acc, acc * NEG_SLOPE)

    # Stride-3 / pad-3 scatter as two exact 0/1 selection matmuls:
    #   out[i, j] = act[r, c]  iff  i == 3r - 3  and  j == 3c - 3
    # Rows r=0 and r=H-1 (and the matching cols) never match, so the interior
    # cropping falls out automatically; all other output positions are zero.
    i_ids = jax.lax.broadcasted_iota(jnp.int32, (H_out, H), 0)
    r_ids = jax.lax.broadcasted_iota(jnp.int32, (H_out, H), 1)
    R = jnp.where(i_ids == 3 * r_ids - 3, 1.0, 0.0).astype(jnp.float32)   # (H_out, H)

    c_ids = jax.lax.broadcasted_iota(jnp.int32, (W, W_out), 0)
    j_ids = jax.lax.broadcasted_iota(jnp.int32, (W, W_out), 1)
    Ct = jnp.where(j_ids == 3 * c_ids - 3, 1.0, 0.0).astype(jnp.float32)  # (W, W_out)

    tmp = jnp.dot(R, act,
                  preferred_element_type=jnp.float32,
                  precision=jax.lax.Precision.HIGHEST)                    # (H_out, W)
    o_ref[0] = jnp.dot(tmp, Ct,
                       preferred_element_type=jnp.float32,
                       precision=jax.lax.Precision.HIGHEST)               # (H_out, W_out)


def convt_model(x, weight):
    """x: (N, 16, H, W); weight: (16, 1, 1, 1) (torch ConvTranspose2d layout).
    Returns (N, 1, 3H-8, 3W-8) float32, matching the PyTorch module's forward."""
    N, C, H, W = x.shape
    assert C == C_IN
    assert H >= 3 and W >= 3, "output size of the transposed conv would be non-positive"
    if x.dtype != jnp.float32:
        x = x.astype(jnp.float32)
    w_vec = jnp.asarray(weight, dtype=jnp.float32).reshape(C)

    H_out, W_out = 3 * H - 8, 3 * W - 8

    out3 = pl.pallas_call(
        convt_fused_kernel,
        out_shape=jax.ShapeDtypeStruct((N, H_out, W_out), jnp.float32),
        grid_spec=pltpu.PrefetchScalarGridSpec(
            num_scalar_prefetch=1,                     # w_vec -> SMEM
            grid=(N,),
            in_specs=[
                pl.BlockSpec((1, C, H, W), lambda b, w: (b, 0, 0, 0)),
            ],
            out_specs=pl.BlockSpec((1, H_out, W_out), lambda b, w: (b, 0, 0)),
        ),
        compiler_params=pltpu.CompilerParams(dimension_semantics=("parallel",)),
    )(w_vec, x)

    return out3[:, None, :, :]


if __name__ == "__main__":
    key = jax.random.PRNGKey(0)
    kx, kw = jax.random.split(key)

    # Small shapes consistent with the module (in_channels must be 16).
    N, H, W = 2, 9, 13
    x = jax.random.normal(kx, (N, C_IN, H, W), dtype=jnp.float32)
    # torch ConvTranspose2d weight layout: (in_channels, out_channels, kH, kW)
    weight = jax.random.normal(kw, (C_IN, 1, 1, 1), dtype=jnp.float32) * 0.1

    out = convt_model(x, weight)
    out = jax.block_until_ready(out)

    # Pure-JAX reference (exact f32 elementwise, no low-precision einsum).
    w_vec = weight.reshape(C_IN)
    dense = jnp.sum(x * w_vec[None, :, None, None], axis=1)                # (N, H, W)
    act_ref = jnp.where(dense > 0, dense, dense * NEG_SLOPE)
    H_out, W_out = 3 * H - 8, 3 * W - 8
    ref = jnp.zeros((N, 1, H_out, W_out), jnp.float32)
    ref = ref.at[:, 0, ::3, ::3].set(act_ref[:, 1:H - 1, 1:W - 1])

    assert out.shape == (N, 1, H_out, W_out)
    assert jnp.allclose(out, ref, atol=1e-5, rtol=1e-4)

    print("KERNEL_OK")
</pallas_src>

<mosaic_0001>
module attributes {stable_mosaic.version = 11 : i64} {
  func.func @convt_fused_kernel(%arg0: i32, %arg1: memref<16xf32, #tpu.memory_space<smem>>, %arg2: memref<1x16x9x13xf32, #tpu.memory_space<vmem>>, %arg3: memref<1x19x31xf32, #tpu.memory_space<vmem>>) attributes {dimension_semantics = [#tpu.dimension_semantics<parallel>], iteration_bounds = array<i64: 2>, scalar_prefetch = 1 : i64, scratch_operands = 0 : i64, tpu.core_type = #tpu.core_type<tc>, window_params = [{transform_indices = @transform_0, window_bounds = array<i64: 1, 16, 9, 13>}, {transform_indices = @transform_1, window_bounds = array<i64: 1, 19, 31>}]} {
    %c0 = arith.constant 0 : index
    %c0_0 = arith.constant 0 : index
    %c0_1 = arith.constant 0 : index
    %c0_2 = arith.constant 0 : index
    %0 = vector.load %arg2[%c0, %c0_0, %c0_1, %c0_2] : memref<1x16x9x13xf32, #tpu.memory_space<vmem>>, vector<1x1x9x13xf32>
    %1 = vector.shape_cast %0 : vector<1x1x9x13xf32> to vector<9x13xf32>
    %c0_3 = arith.constant 0 : index
    %2 = memref.load %arg1[%c0_3] : memref<16xf32, #tpu.memory_space<smem>>
    %3 = vector.broadcast %2 : f32 to vector<9x13xf32>
    %4 = arith.mulf %1, %3 : vector<9x13xf32>
    %c0_4 = arith.constant 0 : index
    %c1 = arith.constant 1 : index
    %c0_5 = arith.constant 0 : index
    %c0_6 = arith.constant 0 : index
    %5 = vector.load %arg2[%c0_4, %c1, %c0_5, %c0_6] : memref<1x16x9x13xf32, #tpu.memory_space<vmem>>, vector<1x1x9x13xf32>
    %6 = vector.shape_cast %5 : vector<1x1x9x13xf32> to vector<9x13xf32>
    %c1_7 = arith.constant 1 : index
    %7 = memref.load %arg1[%c1_7] : memref<16xf32, #tpu.memory_space<smem>>
    %8 = vector.broadcast %7 : f32 to vector<9x13xf32>
    %9 = arith.mulf %6, %8 : vector<9x13xf32>
    %10 = arith.addf %4, %9 : vector<9x13xf32>
    %c0_8 = arith.constant 0 : index
    %c2 = arith.constant 2 : index
    %c0_9 = arith.constant 0 : index
    %c0_10 = arith.constant 0 : index
    %11 = vector.load %arg2[%c0_8, %c2, %c0_9, %c0_10] : memref<1x16x9x13xf32, #tpu.memory_space<vmem>>, vector<1x1x9x13xf32>
    %12 = vector.shape_cast %11 : vector<1x1x9x13xf32> to vector<9x13xf32>
    %c2_11 = arith.constant 2 : index
    %13 = memref.load %arg1[%c2_11] : memref<16xf32, #tpu.memory_space<smem>>
    %14 = vector.broadcast %13 : f32 to vector<9x13xf32>
    %15 = arith.mulf %12, %14 : vector<9x13xf32>
    %16 = arith.addf %10, %15 : vector<9x13xf32>
    %c0_12 = arith.constant 0 : index
    %c3 = arith.constant 3 : index
    %c0_13 = arith.constant 0 : index
    %c0_14 = arith.constant 0 : index
    %17 = vector.load %arg2[%c0_12, %c3, %c0_13, %c0_14] : memref<1x16x9x13xf32, #tpu.memory_space<vmem>>, vector<1x1x9x13xf32>
    %18 = vector.shape_cast %17 : vector<1x1x9x13xf32> to vector<9x13xf32>
    %c3_15 = arith.constant 3 : index
    %19 = memref.load %arg1[%c3_15] : memref<16xf32, #tpu.memory_space<smem>>
    %20 = vector.broadcast %19 : f32 to vector<9x13xf32>
    %21 = arith.mulf %18, %20 : vector<9x13xf32>
    %22 = arith.addf %16, %21 : vector<9x13xf32>
    %c0_16 = arith.constant 0 : index
    %c4 = arith.constant 4 : index
    %c0_17 = arith.constant 0 : index
    %c0_18 = arith.constant 0 : index
    %23 = vector.load %arg2[%c0_16, %c4, %c0_17, %c0_18] : memref<1x16x9x13xf32, #tpu.memory_space<vmem>>, vector<1x1x9x13xf32>
    %24 = vector.shape_cast %23 : vector<1x1x9x13xf32> to vector<9x13xf32>
    %c4_19 = arith.constant 4 : index
    %25 = memref.load %arg1[%c4_19] : memref<16xf32, #tpu.memory_space<smem>>
    %26 = vector.broadcast %25 : f32 to vector<9x13xf32>
    %27 = arith.mulf %24, %26 : vector<9x13xf32>
    %28 = arith.addf %22, %27 : vector<9x13xf32>
    %c0_20 = arith.constant 0 : index
    %c5 = arith.constant 5 : index
    %c0_21 = arith.constant 0 : index
    %c0_22 = arith.constant 0 : index
    %29 = vector.load %arg2[%c0_20, %c5, %c0_21, %c0_22] : memref<1x16x9x13xf32, #tpu.memory_space<vmem>>, vector<1x1x9x13xf32>
    %30 = vector.shape_cast %29 : vector<1x1x9x13xf32> to vector<9x13xf32>
    %c5_23 = arith.constant 5 : index
    %31 = memref.load %arg1[%c5_23] : memref<16xf32, #tpu.memory_space<smem>>
    %32 = vector.broadcast %31 : f32 to vector<9x13xf32>
    %33 = arith.mulf %30, %32 : vector<9x13xf32>
    %34 = arith.addf %28, %33 : vector<9x13xf32>
    %c0_24 = arith.constant 0 : index
    %c6 = arith.constant 6 : index
    %c0_25 = arith.constant 0 : index
    %c0_26 = arith.constant 0 : index
    %35 = vector.load %arg2[%c0_24, %c6, %c0_25, %c0_26] : memref<1x16x9x13xf32, #tpu.memory_space<vmem>>, vector<1x1x9x13xf32>
    %36 = vector.shape_cast %35 : vector<1x1x9x13xf32> to vector<9x13xf32>
    %c6_27 = arith.constant 6 : index
    %37 = memref.load %arg1[%c6_27] : memref<16xf32, #tpu.memory_space<smem>>
    %38 = vector.broadcast %37 : f32 to vector<9x13xf32>
    %39 = arith.mulf %36, %38 : vector<9x13xf32>
    %40 = arith.addf %34, %39 : vector<9x13xf32>
    %c0_28 = arith.constant 0 : index
    %c7 = arith.constant 7 : index
    %c0_29 = arith.constant 0 : index
    %c0_30 = arith.constant 0 : index
    %41 = vector.load %arg2[%c0_28, %c7, %c0_29, %c0_30] : memref<1x16x9x13xf32, #tpu.memory_space<vmem>>, vector<1x1x9x13xf32>
    %42 = vector.shape_cast %41 : vector<1x1x9x13xf32> to vector<9x13xf32>
    %c7_31 = arith.constant 7 : index
    %43 = memref.load %arg1[%c7_31] : memref<16xf32, #tpu.memory_space<smem>>
    %44 = vector.broadcast %43 : f32 to vector<9x13xf32>
    %45 = arith.mulf %42, %44 : vector<9x13xf32>
    %46 = arith.addf %40, %45 : vector<9x13xf32>
    %c0_32 = arith.constant 0 : index
    %c8 = arith.constant 8 : index
    %c0_33 = arith.constant 0 : index
    %c0_34 = arith.constant 0 : index
    %47 = vector.load %arg2[%c0_32, %c8, %c0_33, %c0_34] : memref<1x16x9x13xf32, #tpu.memory_space<vmem>>, vector<1x1x9x13xf32>
    %48 = vector.shape_cast %47 : vector<1x1x9x13xf32> to vector<9x13xf32>
    %c8_35 = arith.constant 8 : index
    %49 = memref.load %arg1[%c8_35] : memref<16xf32, #tpu.memory_space<smem>>
    %50 = vector.broadcast %49 : f32 to vector<9x13xf32>
    %51 = arith.mulf %48, %50 : vector<9x13xf32>
    %52 = arith.addf %46, %51 : vector<9x13xf32>
    %c0_36 = arith.constant 0 : index
    %c9 = arith.constant 9 : index
    %c0_37 = arith.constant 0 : index
    %c0_38 = arith.constant 0 : index
    %53 = vector.load %arg2[%c0_36, %c9, %c0_37, %c0_38] : memref<1x16x9x13xf32, #tpu.memory_space<vmem>>, vector<1x1x9x13xf32>
    %54 = vector.shape_cast %53 : vector<1x1x9x13xf32> to vector<9x13xf32>
    %c9_39 = arith.constant 9 : index
    %55 = memref.load %arg1[%c9_39] : memref<16xf32, #tpu.memory_space<smem>>
    %56 = vector.broadcast %55 : f32 to vector<9x13xf32>
    %57 = arith.mulf %54, %56 : vector<9x13xf32>
    %58 = arith.addf %52, %57 : vector<9x13xf32>
    %c0_40 = arith.constant 0 : index
    %c10 = arith.constant 10 : index
    %c0_41 = arith.constant 0 : index
    %c0_42 = arith.constant 0 : index
    %59 = vector.load %arg2[%c0_40, %c10, %c0_41, %c0_42] : memref<1x16x9x13xf32, #tpu.memory_space<vmem>>, vector<1x1x9x13xf32>
    %60 = vector.shape_cast %59 : vector<1x1x9x13xf32> to vector<9x13xf32>
    %c10_43 = arith.constant 10 : index
    %61 = memref.load %arg1[%c10_43] : memref<16xf32, #tpu.memory_space<smem>>
    %62 = vector.broadcast %61 : f32 to vector<9x13xf32>
    %63 = arith.mulf %60, %62 : vector<9x13xf32>
    %64 = arith.addf %58, %63 : vector<9x13xf32>
    %c0_44 = arith.constant 0 : index
    %c11 = arith.constant 11 : index
    %c0_45 = arith.constant 0 : index
    %c0_46 = arith.constant 0 : index
    %65 = vector.load %arg2[%c0_44, %c11, %c0_45, %c0_46] : memref<1x16x9x13xf32, #tpu.memory_space<vmem>>, vector<1x1x9x13xf32>
    %66 = vector.shape_cast %65 : vector<1x1x9x13xf32> to vector<9x13xf32>
    %c11_47 = arith.constant 11 : index
    %67 = memref.load %arg1[%c11_47] : memref<16xf32, #tpu.memory_space<smem>>
    %68 = vector.broadcast %67 : f32 to vector<9x13xf32>
    %69 = arith.mulf %66, %68 : vector<9x13xf32>
    %70 = arith.addf %64, %69 : vector<9x13xf32>
    %c0_48 = arith.constant 0 : index
    %c12 = arith.constant 12 : index
    %c0_49 = arith.constant 0 : index
    %c0_50 = arith.constant 0 : index
    %71 = vector.load %arg2[%c0_48, %c12, %c0_49, %c0_50] : memref<1x16x9x13xf32, #tpu.memory_space<vmem>>, vector<1x1x9x13xf32>
    %72 = vector.shape_cast %71 : vector<1x1x9x13xf32> to vector<9x13xf32>
    %c12_51 = arith.constant 12 : index
    %73 = memref.load %arg1[%c12_51] : memref<16xf32, #tpu.memory_space<smem>>
    %74 = vector.broadcast %73 : f32 to vector<9x13xf32>
    %75 = arith.mulf %72, %74 : vector<9x13xf32>
    %76 = arith.addf %70, %75 : vector<9x13xf32>
    %c0_52 = arith.constant 0 : index
    %c13 = arith.constant 13 : index
    %c0_53 = arith.constant 0 : index
    %c0_54 = arith.constant 0 : index
    %77 = vector.load %arg2[%c0_52, %c13, %c0_53, %c0_54] : memref<1x16x9x13xf32, #tpu.memory_space<vmem>>, vector<1x1x9x13xf32>
    %78 = vector.shape_cast %77 : vector<1x1x9x13xf32> to vector<9x13xf32>
    %c13_55 = arith.constant 13 : index
    %79 = memref.load %arg1[%c13_55] : memref<16xf32, #tpu.memory_space<smem>>
    %80 = vector.broadcast %79 : f32 to vector<9x13xf32>
    %81 = arith.mulf %78, %80 : vector<9x13xf32>
    %82 = arith.addf %76, %81 : vector<9x13xf32>
    %c0_56 = arith.constant 0 : index
    %c14 = arith.constant 14 : index
    %c0_57 = arith.constant 0 : index
    %c0_58 = arith.constant 0 : index
    %83 = vector.load %arg2[%c0_56, %c14, %c0_57, %c0_58] : memref<1x16x9x13xf32, #tpu.memory_space<vmem>>, vector<1x1x9x13xf32>
    %84 = vector.shape_cast %83 : vector<1x1x9x13xf32> to vector<9x13xf32>
    %c14_59 = arith.constant 14 : index
    %85 = memref.load %arg1[%c14_59] : memref<16xf32, #tpu.memory_space<smem>>
    %86 = vector.broadcast %85 : f32 to vector<9x13xf32>
    %87 = arith.mulf %84, %86 : vector<9x13xf32>
    %88 = arith.addf %82, %87 : vector<9x13xf32>
    %c0_60 = arith.constant 0 : index
    %c15 = arith.constant 15 : index
    %c0_61 = arith.constant 0 : index
    %c0_62 = arith.constant 0 : index
    %89 = vector.load %arg2[%c0_60, %c15, %c0_61, %c0_62] : memref<1x16x9x13xf32, #tpu.memory_space<vmem>>, vector<1x1x9x13xf32>
    %90 = vector.shape_cast %89 : vector<1x1x9x13xf32> to vector<9x13xf32>
    %c15_63 = arith.constant 15 : index
    %91 = memref.load %arg1[%c15_63] : memref<16xf32, #tpu.memory_space<smem>>
    %92 = vector.broadcast %91 : f32 to vector<9x13xf32>
    %93 = arith.mulf %90, %92 : vector<9x13xf32>
    %94 = arith.addf %88, %93 : vector<9x13xf32>
    %cst = arith.constant 0.000000e+00 : f32
    %95 = vector.broadcast %cst : f32 to vector<9x13xf32>
    %96 = arith.cmpf ogt, %94, %95 : vector<9x13xf32>
    %cst_64 = arith.constant -4.840000e-01 : f32
    %97 = vector.broadcast %cst_64 : f32 to vector<9x13xf32>
    %98 = arith.mulf %94, %97 : vector<9x13xf32>
    %99 = arith.select %96, %94, %98 : vector<9x13xi1>, vector<9x13xf32>
    %100 = tpu.iota {dimensions = array<i32: 0>} : vector<19x9xi32>
    %101 = tpu.iota {dimensions = array<i32: 1>} : vector<19x9xi32>
    %c3_i32 = arith.constant 3 : i32
    %102 = vector.broadcast %c3_i32 : i32 to vector<19x9xi32>
    %103 = arith.muli %102, %101 : vector<19x9xi32>
    %c3_i32_65 = arith.constant 3 : i32
    %104 = vector.broadcast %c3_i32_65 : i32 to vector<19x9xi32>
    %105 = arith.subi %103, %104 : vector<19x9xi32>
    %106 = arith.cmpi eq, %100, %105 : vector<19x9xi32>
    %cst_66 = arith.constant 1.000000e+00 : f32
    %cst_67 = arith.constant 0.000000e+00 : f32
    %107 = vector.broadcast %cst_66 : f32 to vector<19x9xf32>
    %108 = vector.broadcast %cst_67 : f32 to vector<19x9xf32>
    %109 = arith.select %106, %107, %108 : vector<19x9xi1>, vector<19x9xf32>
    %110 = tpu.iota {dimensions = array<i32: 0>} : vector<13x31xi32>
    %111 = tpu.iota {dimensions = array<i32: 1>} : vector<13x31xi32>
    %c3_i32_68 = arith.constant 3 : i32
    %112 = vector.broadcast %c3_i32_68 : i32 to vector<13x31xi32>
    %113 = arith.muli %112, %110 : vector<13x31xi32>
    %c3_i32_69 = arith.constant 3 : i32
    %114 = vector.broadcast %c3_i32_69 : i32 to vector<13x31xi32>
    %115 = arith.subi %113, %114 : vector<13x31xi32>
    %116 = arith.cmpi eq, %111, %115 : vector<13x31xi32>
    %cst_70 = arith.constant 1.000000e+00 : f32
    %cst_71 = arith.constant 0.000000e+00 : f32
    %117 = vector.broadcast %cst_70 : f32 to vector<13x31xf32>
    %118 = vector.broadcast %cst_71 : f32 to vector<13x31xf32>
    %119 = arith.select %116, %117, %118 : vector<13x31xi1>, vector<13x31xf32>
    %cst_72 = arith.constant dense<0.000000e+00> : vector<19x13xf32>
    %120 = tpu.matmul %109, %99, %cst_72 {dimension_numbers = #tpu.dot_dimension_numbers<[1], [0], [0], [1], [0, 0, 1, 1], [], []>, precision = #tpu.contract_precision<fp32>} : vector<19x9xf32>, vector<9x13xf32>, vector<19x13xf32> -> vector<19x13xf32>
    %cst_73 = arith.constant dense<0.000000e+00> : vector<19x31xf32>
    %121 = tpu.matmul %120, %119, %cst_73 {dimension_numbers = #tpu.dot_dimension_numbers<[1], [0], [0], [1], [0, 0, 1, 1], [], []>, precision = #tpu.contract_precision<fp32>} : vector<19x13xf32>, vector<13x31xf32>, vector<19x31xf32> -> vector<19x31xf32>
    %c0_74 = arith.constant 0 : index
    %c0_75 = arith.constant 0 : index
    %c0_76 = arith.constant 0 : index
    %122 = vector.load %arg3[%c0_74, %c0_75, %c0_76] : memref<1x19x31xf32, #tpu.memory_space<vmem>>, vector<1x19x31xf32>
    %123 = vector.shape_cast %122 : vector<1x19x31xf32> to vector<19x31xf32>
    %124 = vector.shape_cast %121 : vector<19x31xf32> to vector<1x19x31xf32>
    tpu.vector_store %arg3[%c0_74, %c0_75, %c0_76], %124 {strides = array<i32>} : memref<1x19x31xf32, #tpu.memory_space<vmem>>, vector<1x19x31xf32>,
    return
  }
  func.func @transform_0(%arg0: i32, %arg1: memref<16xf32, #tpu.memory_space<smem>>) -> (i32, i32, i32, i32) {
    %c0_i32 = arith.constant 0 : i32
    %c0_i32_0 = arith.constant 0 : i32
    %c0_i32_1 = arith.constant 0 : i32
    %c0_i32_2 = arith.constant 0 : i32
    return %arg0, %c0_i32, %c0_i32_0, %c0_i32_1 : i32, i32, i32, i32
  }
  func.func @transform_1(%arg0: i32, %arg1: memref<16xf32, #tpu.memory_space<smem>>) -> (i32, i32, i32) {
    %c0_i32 = arith.constant 0 : i32
    %c0_i32_0 = arith.constant 0 : i32
    %c0_i32_1 = arith.constant 0 : i32
    return %arg0, %c0_i32, %c0_i32_0 : i32, i32, i32
  }
}

</mosaic_0001>

<bundles_post_ra>
// kernel: tpu_custom_call.1
= control target key start
LH: loop header
LB: loop body
LE: loop exit
PB: predicated region body
PF: predicated region fallthrough
CT: control target
= control target key end

     0   :  { %s2172_s0 = inlined_call_operand.vmem [shape: f32[16], index: 0, kind: input, shape index: {}]   ;;  %s2173_s1 = inlined_call_operand.vmem [shape: f32[2,16,9,13], index: 1, kind: input, shape index: {}]   ;;  %s2174_s2 = inlined_call_operand.vmem [shape: f32[2,19,31], index: 2, kind: output, shape index: {}]  }
   0x1   :  { %s7_s11 = sshll.u32 %s2172_s0, 4  ;;  %s8_s11 = int_to_ptr.vmem [resolvable:$true] %s7_s11 }
   0x2   :  { %s1868_s12 = scalar_lea.vmem %s8_s11, 16  ;;  %p1873_p1 = scmp.lt.s32.totalorder %s8_s11, %s8_s11 }
   0x3   :  { %p1869_p0 = scmp.ne.s32.totalorder %s8_s11, %s1868_s12  ;;  %p1874_p2 = scmp.lt.s32.totalorder %s1868_s12, %s1868_s12 }
   0x5   :  { %p1875_p3 = por %p1874_p2, %p1873_p1 }
   0x7   :  { %p1876_p4 = pnand %p1875_p3, %p1869_p0 }
   0x9   :  { %1879 = shalt.err (!%p1876_p4)  }
   0xa   :  { %s1890_s13 = smov [#allocation3]  }
   0xb   :  { %10 = dma.vmem_to_smem %s8_s11, 16, %s1890_s13, [#allocation2] }
   0xc   :  { %1884 = dma.done.wait [#allocation2], 16 }
   0xd   :  { %1885 = vsyncadd [#allocation2], 4294967280 }
   0xe   :  { %12 = sfence }
   0xf   :  { %s1913_s14 = smov 0  }
  0x10 LB: > { %s1465_s0 = sadd.s32 4294967295, %s1888_s14   ;;  %p1469_p5 = scmp.ge.s32.totalorder %s1888_s14, 1  ;;  %s1888_s14 = sphi %s1913_s14, %s18_s14  }
  0x11   : > { %p94_p6 = scmp.lt.s32.totalorder %s1888_s14, 3 }
  0x13   : > { %p95_p7 = pnand %p1469_p5, %p94_p6 }
  0x14   : > { %p114_p8 = scmp.lt.s32.totalorder (!%p95_p7), %s1465_s0, 1  ;;  %s126_s15 = sld [smem:[#allocation3]] (!%p95_p7)  ;;  %v1891_v0 = vmov (!%p95_p7), 0.0|0.0   ;;  %vm1892_vm0 = vmmov (!%p95_p7), 0   ;;  %v1893_v1 = vmov (!%p95_p7), 0.0   ;;  %v271_v2 = vlaneseq (!%p95_p7) }
  0x15   : > { %98 = sbr.rel (%p95_p7) target bundleno = 640 (0x280), region = 24  ;;  %1755 = vmatprep.subr.bf16.mxu0 (!%p95_p7), %v1891_v0  ;;  %s1475_s16 = sld [smem:[#allocation3 + $0x1]] (!%p95_p7)  ;;  %1773 = vmatprep.subr.bf16.mxu1 (!%p95_p7), %v1891_v0  ;;  %vm293_vm2 = vcmask (!%p95_p7), 72704   ;;  %vm303_vm5 = vcmask (!%p95_p7), 1040384   ;;  %vm862_vm10 = vcmask (!%p95_p7), 1044480   ;;  %vm852_vm12 = vcmask (!%p95_p7), 105472  }
  0x16   : > { %s1922_s17 = sld [smem:[#allocation3 + $0x2]] (!%p95_p7)  ;;  %1603 = vmatprep.mubr.msk.f32.mxu0 (!%p95_p7), %vm1892_vm0, %v1893_v1  ;;  %1681 = vmatprep.mubr.msk.f32.mxu1 (!%p95_p7), %vm1892_vm0, %v1893_v1  ;;  %s1931_s18 = sld [smem:[#allocation3 + $0x3]] (!%p95_p7)  ;;  %v1956_v18 = vand.u32 (!%p95_p7), 127, %v271_v2  ;;  %v1980_v47 = vshrl.u32 (!%p95_p7), %v271_v2, 7  ;;  %vm1405_vm13 = vcmask (!%p95_p7), 252928   ;;  %vm1408_vm14 = vcmask (!%p95_p7), 247808  }
  0x17   : > { %s1933_s19 = sld [smem:[#allocation3 + $0x4]] (!%p95_p7)  ;;  %s1936_s21 = sld [smem:[#allocation3 + $0x5]] (!%p95_p7) }
  0x18   : > { %s1943_s25 = sld [smem:[#allocation3 + $0x6]] (!%p95_p7)  ;;  %s1948_s26 = sld [smem:[#allocation3 + $0x7]] (!%p95_p7)  ;;  %v277_v39 = vmul.u32 (!%p95_p7), 3, %v1956_v18 }
  0x19   : > { %s1962_s27 = sld [smem:[#allocation3 + $0x8]] (!%p95_p7)  ;;  %s1967_s28 = sld [smem:[#allocation3 + $0x9]] (!%p95_p7) }
  0x1a   : > { %v127_v5 = vstv (!%p95_p7), %s126_s15  ;;  %s1972_s29 = sld [smem:[#allocation3 + $0xa]] (!%p95_p7)  ;;  %s1978_s30 = sld [smem:[#allocation3 + $0xb]] (!%p95_p7)  ;;  %v1987_v55 = vadd.s32 (!%p95_p7), 4294967293, %v277_v39 }
  0x1b   : > { %v134_v10 = vstv (!%p95_p7), %s1475_s16  ;;  %s1985_s3 = sld [smem:[#allocation3 + $0xc]] (!%p95_p7)  ;;  %s1992_s4 = sld [smem:[#allocation3 + $0xd]] (!%p95_p7) }
  0x1c   : > { %s2178_s0 = smov (!%p114_p8, %s1465_s0), 1  ;;  %v143_v15 = vstv %s1922_s17  ;;  %v152_v21 = vstv %s1931_s18  ;;  %s1997_s5 = sld [smem:[#allocation3 + $0xe]]  ;;  %vm279_vm1 = vcmp.eq.s32.totalorder %v1980_v47, %v1987_v55 }
  0x1d   : > { %s1538_s20 = sshll.u32 %s2178_s0, 8  ;;  %v161_v24 = vstv %s1933_s19  ;;  %v170_v31 = vstv %s1936_s21  ;;  %s2004_s6 = sld [smem:[#allocation3 + $0xf]] }
  0x1e   : > { %s1941_s24 = scalar_lea.vmem %s2173_s1, %s1538_s20  ;;  %v179_v38 = vstv %s1943_s25  ;;  %v188_v46 = vstv %s1948_s26  ;;  %s1854_s7 = smul.u32 24, %s2178_s0 }
  0x1f   : > { %v124_v3 = vld [vmem:[%s1941_s24] sm:$0xff]  ;;  %v125_v4 = vld [vmem:[%s1941_s24 + $0x8] sm:$0x1]  ;;  %v1473_v6 = vld [vmem:[%s1941_s24 + $0x10] sm:$0xff]  ;;  %v197_v54 = vstv %s1962_s27 }
  0x20   : > { %v128_v7 = vmul.f32 %v127_v5, %v124_v3  ;;  %v129_v8 = vmul.f32 %v127_v5, %v125_v4  ;;  %v1474_v9 = vld [vmem:[%s1941_s24 + $0x18] sm:$0x1]  ;;  %v1476_v11 = vld [vmem:[%s1941_s24 + $0x20] sm:$0xff]  ;;  %v1477_v12 = vld [vmem:[%s1941_s24 + $0x28] sm:$0x1]  ;;  %v135_v13 = vmul.f32 %v1473_v6, %v134_v10  ;;  %v206_v62 = vstv %s1967_s28  ;;  %s123_s10 = scalar_lea.vmem %s2174_s2, %s1854_s7 }
  0x21   : > { %v136_v14 = vmul.f32 %v1474_v9, %v134_v10  ;;  %v1479_v16 = vld [vmem:[%s1941_s24 + $0x30] sm:$0xff]  ;;  %v1480_v17 = vld [vmem:[%s1941_s24 + $0x38] sm:$0x1]  ;;  %v144_v19 = vmul.f32 %v1476_v11, %v143_v15  ;;  %v145_v20 = vmul.f32 %v1477_v12, %v143_v15  ;;  %v1482_v22 = vld [vmem:[%s1941_s24 + $0x40] sm:$0xff] }
  0x22   : > { %v1483_v23 = vld [vmem:[%s1941_s24 + $0x48] sm:$0x1]  ;;  %v137_v25 = vadd.f32 %v135_v13, %v128_v7  ;;  %v153_v27 = vmul.f32 %v1479_v16, %v152_v21  ;;  %v154_v28 = vmul.f32 %v1480_v17, %v152_v21  ;;  %v1485_v29 = vld [vmem:[%s1941_s24 + $0x50] sm:$0xff]  ;;  %v1486_v30 = vld [vmem:[%s1941_s24 + $0x58] sm:$0x1]  ;;  %v162_v34 = vmul.f32 %v1482_v22, %v161_v24 }
  0x23   : > { %v138_v26 = vadd.f32 %v136_v14, %v129_v8  ;;  %v163_v35 = vmul.f32 %v1483_v23, %v161_v24  ;;  %v1488_v36 = vld [vmem:[%s1941_s24 + $0x60] sm:$0xff]  ;;  %v1489_v37 = vld [vmem:[%s1941_s24 + $0x68] sm:$0x1]  ;;  %v171_v42 = vmul.f32 %v1485_v29, %v170_v31  ;;  %v172_v43 = vmul.f32 %v1486_v30, %v170_v31  ;;  %v1491_v44 = vld [vmem:[%s1941_s24 + $0x70] sm:$0xff] }
  0x24   : > { %v146_v32 = vadd.f32 %v144_v19, %v137_v25  ;;  %v1492_v45 = vld [vmem:[%s1941_s24 + $0x78] sm:$0x1]  ;;  %v180_v50 = vmul.f32 %v1488_v36, %v179_v38  ;;  %v181_v51 = vmul.f32 %v1489_v37, %v179_v38  ;;  %v1494_v52 = vld [vmem:[%s1941_s24 + $0x80] sm:$0xff]  ;;  %v1495_v53 = vld [vmem:[%s1941_s24 + $0x88] sm:$0x1]  ;;  %v189_v58 = vmul.f32 %v1491_v44, %v188_v46 }
  0x25   : > { %v147_v33 = vadd.f32 %v145_v20, %v138_v26  ;;  %v190_v59 = vmul.f32 %v1492_v45, %v188_v46  ;;  %v1497_v60 = vld [vmem:[%s1941_s24 + $0x90] sm:$0xff]  ;;  %v1498_v61 = vld [vmem:[%s1941_s24 + $0x98] sm:$0x1]  ;;  %v198_v3 = vmul.f32 %v1494_v52, %v197_v54  ;;  %v199_v4 = vmul.f32 %v1495_v53, %v197_v54  ;;  %v1500_v5 = vld [vmem:[%s1941_s24 + $0xa0] sm:$0xff] }
  0x26   : > { %v155_v40 = vadd.f32 %v153_v27, %v146_v32  ;;  %v1501_v6 = vld [vmem:[%s1941_s24 + $0xa8] sm:$0x1]  ;;  %v215_v7 = vstv %s1972_s29  ;;  %v207_v10 = vmul.f32 %v1497_v60, %v206_v62  ;;  %v208_v11 = vmul.f32 %v1498_v61, %v206_v62  ;;  %v1503_v12 = vld [vmem:[%s1941_s24 + $0xb0] sm:$0xff]  ;;  %v1504_v13 = vld [vmem:[%s1941_s24 + $0xb8] sm:$0x1] }
  0x27   : > { %v156_v41 = vadd.f32 %v154_v28, %v147_v33  ;;  %v224_v14 = vstv %s1978_s30  ;;  %v216_v17 = vmul.f32 %v1500_v5, %v215_v7  ;;  %v217_v19 = vmul.f32 %v1501_v6, %v215_v7  ;;  %v1506_v20 = vld [vmem:[%s1941_s24 + $0xc0] sm:$0xff]  ;;  %v1507_v21 = vld [vmem:[%s1941_s24 + $0xc8] sm:$0x1]  ;;  %v1509_v29 = vld [vmem:[%s1941_s24 + $0xd0] sm:$0xff] }
  0x28   : > { %v164_v48 = vadd.f32 %v162_v34, %v155_v40  ;;  %v233_v22 = vstv %s1985_s3  ;;  %v2013_v23 = vsel %vm279_vm1, 1.0, %v1893_v1  ;;  %v2016_v24 = vadd.s32 8, %v1980_v47  ;;  %v1510_v30 = vld [vmem:[%s1941_s24 + $0xd8] sm:$0x1]  ;;  %v1512_v36 = vld [vmem:[%s1941_s24 + $0xe0] sm:$0xff]  ;;  %v1515_v45 = vld [vmem:[%s1941_s24 + $0xf0] sm:$0xff] }
  0x29   : > { %v165_v49 = vadd.f32 %v163_v35, %v156_v41  ;;  %v225_v27 = vmul.f32 %v1503_v12, %v224_v14  ;;  %v226_v28 = vmul.f32 %v1504_v13, %v224_v14  ;;  %v242_v31 = vstv %s1992_s4  ;;  %v1513_v37 = vld [vmem:[%s1941_s24 + $0xe8] sm:$0x1]  ;;  %v1516_v46 = vld [vmem:[%s1941_s24 + $0xf8] sm:$0x1] }
  0x2a   : > { %v173_v56 = vadd.f32 %v171_v42, %v164_v48  ;;  %v234_v34 = vmul.f32 %v1506_v20, %v233_v22  ;;  %v235_v35 = vmul.f32 %v1507_v21, %v233_v22  ;;  %v251_v38 = vstv %s1997_s5 }
  0x2b   : > { %v174_v57 = vadd.f32 %v172_v43, %v165_v49  ;;  %v295_v39 = vsel %vm293_vm2, %v2013_v23, 0  ;;  %vm280_vm3 = vcmp.eq.s32.totalorder %v2016_v24, %v1987_v55  ;;  %v274_v40 = vadd.s32 16, %v1980_v47 }
  0x2c   : > { %v182_v63 = vadd.f32 %v180_v50, %v173_v56  ;;  %v243_v43 = vmul.f32 %v1509_v29, %v242_v31  ;;  %v244_v44 = vmul.f32 %v1510_v30, %v242_v31  ;;  %v260_v48 = vstv %s2004_s6 }
  0x2d   : > { %v183_v2 = vadd.f32 %v181_v51, %v174_v57  ;;  %v252_v51 = vmul.f32 %v1512_v36, %v251_v38  ;;  %v253_v52 = vmul.f32 %v1513_v37, %v251_v38  ;;  %v2032_v53 = vsub.f32 %v295_v39, %v295_v39 }
  0x2e   : > { %v191_v8 = vadd.f32 %v189_v58, %v182_v63  ;;  %v2035_v54 = vsel %vm280_vm3, 1.0, %v1893_v1  ;;  %vm281_vm4 = vcmp.eq.s32.totalorder %v274_v40, %v1987_v55  ;;  %v261_v58 = vmul.f32 %v1515_v45, %v260_v48 }
  0x2f   : > { %v192_v9 = vadd.f32 %v190_v59, %v183_v2  ;;  %v262_v59 = vmul.f32 %v1516_v46, %v260_v48  ;;  %v298_v62 = vsel %vm293_vm2, %v2035_v54, 0  ;;  %v2041_v63 = vsel %vm281_vm4, 1.0, %v1893_v1 }
  0x30   : > { %v200_v15 = vadd.f32 %v198_v3, %v191_v8  ;;  %v385_v5 = vsub.f32 %v298_v62, %v298_v62  ;;  %v301_v55 = vsel %vm293_vm2, %v2041_v63, 0  ;;  %v286_v37 = vmul.u32 3, %v2016_v24 }
  0x31   : > { %v201_v16 = vadd.f32 %v199_v4, %v192_v9  ;;  %v376_v4 = vand.u32 4294901760, %v2032_v53  ;;  %v395_v14 = vsub.f32 %v301_v55, %v301_v55  ;;  %v285_v38 = vmul.u32 3, %v1980_v47 }
  0x32   : > { %v209_v25 = vadd.f32 %v207_v10, %v200_v15  ;;  %v386_v13 = vand.u32 4294901760, %v385_v5  ;;  %v1520_v39 = vadd.s32 4294967293, %v286_v37 }
  0x33   : > { %v210_v26 = vadd.f32 %v208_v11, %v201_v16  ;;  %v377_v10 = vsub.f32 %v2032_v53, %v376_v4  ;;  %v1519_v40 = vadd.s32 4294967293, %v285_v38 }
  0x34   : > { %v218_v32 = vadd.f32 %v216_v17, %v209_v25  ;;  %v387_v21 = vsub.f32 %v385_v5, %v386_v13  ;;  %v396_v25 = vand.u32 4294901760, %v395_v14  ;;  %vm290_vm8 = vcmp.eq.s32.totalorder %v1956_v18, %v1520_v39 }
  0x35   : > { %v219_v33 = vadd.f32 %v217_v19, %v210_v26  ;;  %v378_v20 = vand.u32 4294901760, %v377_v10  ;;  %vm289_vm9 = vcmp.eq.s32.totalorder %v1956_v18, %v1519_v40 }
  0x36   : > { %v227_v41 = vadd.f32 %v225_v27, %v218_v32  ;;  %v388_v29 = vand.u32 4294901760, %v387_v21  ;;  %v397_v31 = vsub.f32 %v395_v14, %v396_v25  ;;  %vm2112_vm11 = vmpackc.low %vm862_vm10, %vm289_vm9  ;;  %v291_v47 = vsel %vm289_vm9, 1.0, %v1893_v1 }
  0x37   : > { %v228_v42 = vadd.f32 %v226_v28, %v219_v33 }
  0x38   : > { %v236_v49 = vadd.f32 %v234_v34, %v227_v41  ;;  %v398_v34 = vand.u32 4294901760, %v397_v31  ;;  %v1894_v41 = vmov 1.0  }
  0x39   : > { %v237_v50 = vadd.f32 %v235_v35, %v228_v42 }
  0x3a   : > { %v245_v56 = vadd.f32 %v243_v43, %v236_v49 }
  0x3b   : > { %v246_v57 = vadd.f32 %v244_v44, %v237_v50  ;;  %v963_v44 = vsub.f32 %v291_v47, %v291_v47 }
  0x3c   : > { %v254_v60 = vadd.f32 %v252_v51, %v245_v56 }
  0x3d   : > { %v255_v61 = vadd.f32 %v253_v52, %v246_v57  ;;  %v964_v18 = vand.u32 4294901760, %v963_v44 }
  0x3e   : > { %v263_v2 = vadd.f32 %v261_v58, %v254_v60 }
  0x3f   : > { %v264_v3 = vadd.f32 %v262_v59, %v255_v61  ;;  %v965_v48 = vsub.f32 %v963_v44, %v964_v18 }
  0x40   : > { %vm265_vm6 = vcmp.gt.f32.partialorder %v263_v2, 0.0  ;;  %v267_v6 = vmul.f32 -0.484, %v263_v2 }
  0x41   : > { %vm266_vm7 = vcmp.gt.f32.partialorder %v264_v3, 0.0  ;;  %v268_v7 = vmul.f32 -0.484, %v264_v3  ;;  %v966_v50 = vand.u32 4294901760, %v965_v48 }
  0x42   : > { %v269_v8 = vsel %vm265_vm6, %v263_v2, %v267_v6 }
  0x43   : > { %v270_v9 = vsel %vm266_vm7, %v264_v3, %v268_v7  ;;  %v308_v12 = vand.u32 4294901760, %v269_v8 }
  0x44   : > { %v305_v11 = vsel %vm303_vm5, %v270_v9, 0 }
  0x45   : > { %v311_v15 = vand.u32 4294901760, %v305_v11  ;;  %v406_v16 = vsub.f32 %v269_v8, %v308_v12 }
  0x47   : > { %v1756_v17 = vpack.c.bf16 %v311_v15, %v308_v12  ;;  %v413_v19 = vsub.f32 %v305_v11, %v311_v15  ;;  %v407_v22 = vand.u32 4294901760, %v406_v16 }
  0x49   : > { %1757 = vmatpush3.bf16.msra.mxu0 %v1756_v17  ;;  %v414_v26 = vand.u32 4294901760, %v413_v19  ;;  %v408_v27 = vsub.f32 %v406_v16, %v407_v22  ;;  %v1762_v35 = vpack.c.bf16 %v413_v19, %v406_v16 }
  0x4a   : > { %1758 = vmatprep.subr.bf16.mxu0 %v1891_v0 }
  0x4b   : > { %v415_v28 = vsub.f32 %v413_v19, %v414_v26  ;;  %v409_v30 = vand.u32 4294901760, %v408_v27  ;;  %v1768_v36 = vpack.c.bf16 %v414_v26, %v407_v22 }
  0x4c   : > { %1604 = vmatmul.mubr.f32.vlgmr.msra.gmra.mrb[0].mxu0 %v378_v20 }
  0x4d   : > { %1606 = vmatprep.mubr.msk.f32.mxu0 %vm1892_vm0, %v1893_v1  ;;  %v416_v32 = vand.u32 4294901760, %v415_v28 }
  0x4f   : > { %v1759_v33 = vpack.c.bf16 %v416_v32, %v409_v30 }
  0x50   : > { %1607 = vmatmul.mubr.f32.gmra.mrb[2].mxu0 %v388_v29 }
  0x51   : > { %1760 = vmatpush3.bf16.msra.mxu0 %v1759_v33  ;;  %1609 = vmatprep.mubr.msk.f32.mxu0 %vm1892_vm0, %v1893_v1 }
  0x52   : > { %1761 = vmatprep.subr.bf16.mxu0 %v1891_v0 }
  0x54   : > { %1610 = vmatmul.mubr.f32.gmra.mrb[4].mxu0 %v398_v34 }
  0x55   : > { %1616 = vmatprep.mubr.msk.f32.mxu0 %vm1892_vm0, %v1893_v1 }
  0x58   : > { %1617 = vmatmul.mubr.msk.f32.vlgmr.msra.gmra.mrb[0].mxu0 %vm293_vm2, %v2013_v23 }
  0x59   : > { %1619 = vmatprep.mubr.msk.f32.mxu0 %vm1892_vm0, %v1893_v1  ;;  %1763 = vmatpush3.bf16.msra.mxu0 %v1762_v35 }
  0x5a   : > { %1764 = vmatprep.subr.bf16.mxu0 %v1891_v0 }
  0x5c   : > { %1620 = vmatmul.mubr.msk.f32.gmra.mrb[2].mxu0 %vm293_vm2, %v2035_v54 }
  0x5d   : > { %1622 = vmatprep.mubr.msk.f32.mxu0 %vm1892_vm0, %v1893_v1 }
  0x60   : > { %1623 = vmatmul.mubr.msk.f32.gmra.mrb[4].mxu0 %vm293_vm2, %v2041_v63 }
  0x61   : > { %1629 = vmatprep.mubr.msk.f32.mxu0 %vm1892_vm0, %v1893_v1 }
  0x64   : > { %1630 = vmatmul.mubr.f32.vlgmr.msra.gmra.mrb[0].mxu0 %v2032_v53 }
  0x65   : > { %1632 = vmatprep.mubr.msk.f32.mxu0 %vm1892_vm0, %v1893_v1  ;;  %1766 = vmatpush3.bf16.msra.mxu0 %v1756_v17 }
  0x66   : > { %1767 = vmatprep.subr.bf16.mxu0 %v1891_v0 }
  0x68   : > { %1633 = vmatmul.mubr.f32.gmra.mrb[2].mxu0 %v385_v5 }
  0x69   : > { %1635 = vmatprep.mubr.msk.f32.mxu0 %vm1892_vm0, %v1893_v1 }
  0x6c   : > { %1636 = vmatmul.mubr.f32.gmra.mrb[4].mxu0 %v395_v14 }
  0x6d   : > { %1642 = vmatprep.mubr.msk.f32.mxu0 %vm1892_vm0, %v1893_v1 }
  0x70   : > { %1643 = vmatmul.mubr.f32.vlgmr.msra.gmra.mrb[0].mxu0 %v376_v4 }
  0x71   : > { %1645 = vmatprep.mubr.msk.f32.mxu0 %vm1892_vm0, %v1893_v1  ;;  %1769 = vmatpush3.bf16.msra.mxu0 %v1768_v36 }
  0x72   : > { %1770 = vmatprep.subr.bf16.mxu0 %v1891_v0 }
  0x74   : > { %1646 = vmatmul.mubr.f32.gmra.mrb[2].mxu0 %v386_v13 }
  0x75   : > { %1648 = vmatprep.mubr.msk.f32.mxu0 %vm1892_vm0, %v1893_v1 }
  0x78   : > { %1649 = vmatmul.mubr.f32.gmra.mrb[4].mxu0 %v396_v25 }
  0x79   : > { %1655 = vmatprep.mubr.msk.f32.mxu0 %vm1892_vm0, %v1893_v1 }
  0x7c   : > { %1656 = vmatmul.mubr.msk.f32.vlgmr.msra.gmra.mrb[0].mxu0 %vm293_vm2, %v2013_v23 }
  0x7d   : > { %1658 = vmatprep.mubr.msk.f32.mxu0 %vm1892_vm0, %v1893_v1  ;;  %1772 = vmatpush3.bf16.msra.mxu0 %v1756_v17 }
  0x80   : > { %1659 = vmatmul.mubr.msk.f32.gmra.mrb[2].mxu0 %vm293_vm2, %v2035_v54 }
  0x81   : > { %1661 = vmatprep.mubr.msk.f32.mxu0 %vm1892_vm0, %v1893_v1 }
  0x84   : > { %1662 = vmatmul.mubr.msk.f32.gmra.mrb[4].mxu0 %vm293_vm2, %v2041_v63 }
  0x85   : > { %1668 = vmatprep.mubr.msk.f32.mxu0 %vm1892_vm0, %v1893_v1 }
  0x88   : > { %1669 = vmatmul.mubr.msk.f32.vlgmr.msra.gmra.mrb[0].mxu0 %vm293_vm2, %v2013_v23  ;;  %v292_v23 = vsel %vm290_vm8, 1.0, %v1893_v1 }
  0x89   : > { %1671 = vmatprep.mubr.msk.f32.mxu0 %vm1892_vm0, %v1893_v1  ;;  %v2110_v42 = vpack.c.bf16 %v292_v23, %v1894_v41  ;;  %v864_v24 = vsel %vm862_vm10, %v292_v23, 0 }
  0x8a   : > { %v970_v45 = vsub.f32 %v864_v24, %v864_v24 }
  0x8b   : > { %1776 = vmatpush3.bf16.msk.msra.mxu1 %vm2112_vm11, %v2110_v42 }
  0x8c   : > { %1672 = vmatmul.mubr.msk.f32.gmra.mrb[2].mxu0 %vm293_vm2, %v2035_v54  ;;  %1777 = vmatprep.subr.bf16.mxu1 %v1891_v0  ;;  %v971_v46 = vand.u32 4294901760, %v970_v45  ;;  %v1781_v53 = vpack.c.bf16 %v970_v45, %v963_v44 }
  0x8d   : > { %1674 = vmatprep.mubr.msk.f32.mxu0 %vm1892_vm0, %v1893_v1 }
  0x8e   : > { %v972_v49 = vsub.f32 %v970_v45, %v971_v46  ;;  %v1788_v54 = vpack.c.bf16 %v971_v46, %v964_v18 }
  0x90   : > { %1675 = vmatmul.mubr.msk.f32.gmra.mrb[4].mxu0 %vm293_vm2, %v2041_v63  ;;  %v973_v51 = vand.u32 4294901760, %v972_v49 }
  0x92   : > { %v1778_v52 = vpack.c.bf16 %v973_v51, %v966_v50 }
 0x15b   : > { %v836_v56 = vpop.f32.mrb[0].mxu0 }
 0x15c   : > { %v854_v57 = vsel %vm852_vm12, %v836_v56, 0  ;;  %v1670_v58 = vpop.f32.mrb[1].mxu0 }
 0x15d   : > { %v932_v59 = vand.u32 4294901760, %v854_v57 }
 0x15f   : > { %v933_v60 = vsub.f32 %v854_v57, %v932_v59  ;;  %v842_v61 = vpop.f32.mrb[2].mxu0 }
 0x160   : > { %v857_v62 = vsel %vm852_vm12, %v842_v61, 0  ;;  %v1673_v63 = vpop.f32.mrb[3].mxu0 }
 0x161   : > { %v934_v2 = vand.u32 4294901760, %v933_v60  ;;  %v942_v3 = vand.u32 4294901760, %v857_v62 }
 0x163   : > { %v943_v4 = vsub.f32 %v857_v62, %v942_v3  ;;  %v848_v5 = vpop.f32.mrb[4].mxu0  ;;  %v935_v55 = vsub.f32 %v933_v60, %v934_v2 }
 0x164   : > { %v860_v6 = vsel %vm852_vm12, %v848_v5, 0  ;;  %v1676_v7 = vpop.f32.mrb[5].mxu0 }
 0x165   : > { %v944_v8 = vand.u32 4294901760, %v943_v4  ;;  %v952_v9 = vand.u32 4294901760, %v860_v6  ;;  %v936_v10 = vand.u32 4294901760, %v935_v55 }
 0x167   : > { %v953_v11 = vsub.f32 %v860_v6, %v952_v9  ;;  %1682 = vmatmul.mubr.f32.vlgmr.msra.gmra.mrb[0].mxu1 %v936_v10  ;;  %v945_v12 = vsub.f32 %v943_v4, %v944_v8 }
 0x168   : > { %1684 = vmatprep.mubr.msk.f32.mxu1 %vm1892_vm0, %v1893_v1  ;;  %1779 = vmatpush3.bf16.msra.mxu1 %v1778_v52 }
 0x169   : > { %v954_v13 = vand.u32 4294901760, %v953_v11  ;;  %v946_v14 = vand.u32 4294901760, %v945_v12  ;;  %1780 = vmatprep.subr.bf16.mxu1 %v1891_v0 }
 0x16b   : > { %1685 = vmatmul.mubr.f32.gmra.mrb[2].mxu1 %v946_v14  ;;  %v955_v15 = vsub.f32 %v953_v11, %v954_v13 }
 0x16c   : > { %1687 = vmatprep.mubr.msk.f32.mxu1 %vm1892_vm0, %v1893_v1 }
 0x16d   : > { %v956_v16 = vand.u32 4294901760, %v955_v15 }
 0x16f   : > { %1688 = vmatmul.mubr.f32.gmra.mrb[4].mxu1 %v956_v16 }
 0x170   : > { %1694 = vmatprep.mubr.msk.f32.mxu1 %vm1892_vm0, %v1893_v1 }
 0x173   : > { %1695 = vmatmul.mubr.f32.vlgmr.msra.gmra.mrb[0].mxu1 %v932_v59 }
 0x174   : > { %1697 = vmatprep.mubr.msk.f32.mxu1 %vm1892_vm0, %v1893_v1  ;;  %1782 = vmatpush3.bf16.msra.mxu1 %v1781_v53 }
 0x175   : > { %1783 = vmatprep.subr.bf16.mxu1 %v1891_v0 }
 0x177   : > { %1698 = vmatmul.mubr.f32.gmra.mrb[2].mxu1 %v942_v3 }
 0x178   : > { %1700 = vmatprep.mubr.msk.f32.mxu1 %vm1892_vm0, %v1893_v1 }
 0x17b   : > { %1701 = vmatmul.mubr.f32.gmra.mrb[4].mxu1 %v952_v9 }
 0x17c   : > { %1707 = vmatprep.mubr.msk.f32.mxu1 %vm1892_vm0, %v1893_v1 }
 0x17f   : > { %1708 = vmatmul.mubr.f32.vlgmr.msra.gmra.mrb[0].mxu1 %v933_v60 }
 0x180   : > { %1710 = vmatprep.mubr.msk.f32.mxu1 %vm1892_vm0, %v1893_v1  ;;  %1786 = vmatpush3.bf16.msk.msra.mxu1 %vm2112_vm11, %v2110_v42 }
 0x181   : > { %1787 = vmatprep.subr.bf16.mxu1 %v1891_v0 }
 0x183   : > { %1711 = vmatmul.mubr.f32.gmra.mrb[2].mxu1 %v943_v4 }
 0x184   : > { %1713 = vmatprep.mubr.msk.f32.mxu1 %vm1892_vm0, %v1893_v1 }
 0x187   : > { %1714 = vmatmul.mubr.f32.gmra.mrb[4].mxu1 %v953_v11 }
 0x188   : > { %1720 = vmatprep.mubr.msk.f32.mxu1 %vm1892_vm0, %v1893_v1 }
 0x18b   : > { %1721 = vmatmul.mubr.f32.vlgmr.msra.gmra.mrb[0].mxu1 %v934_v2 }
 0x18c   : > { %1723 = vmatprep.mubr.msk.f32.mxu1 %vm1892_vm0, %v1893_v1  ;;  %1789 = vmatpush3.bf16.msra.mxu1 %v1788_v54 }
 0x18d   : > { %1790 = vmatprep.subr.bf16.mxu1 %v1891_v0 }
 0x18f   : > { %1724 = vmatmul.mubr.f32.gmra.mrb[2].mxu1 %v944_v8 }
 0x190   : > { %1726 = vmatprep.mubr.msk.f32.mxu1 %vm1892_vm0, %v1893_v1 }
 0x193   : > { %1727 = vmatmul.mubr.f32.gmra.mrb[4].mxu1 %v954_v13 }
 0x194   : > { %1733 = vmatprep.mubr.msk.f32.mxu1 %vm1892_vm0, %v1893_v1 }
 0x197   : > { %1734 = vmatmul.mubr.f32.vlgmr.msra.gmra.mrb[0].mxu1 %v932_v59 }
 0x198   : > { %1736 = vmatprep.mubr.msk.f32.mxu1 %vm1892_vm0, %v1893_v1  ;;  %1793 = vmatpush3.bf16.msk.msra.mxu1 %vm2112_vm11, %v2110_v42 }
 0x19b   : > { %1737 = vmatmul.mubr.f32.gmra.mrb[2].mxu1 %v942_v3 }
 0x19c   : > { %1739 = vmatprep.mubr.msk.f32.mxu1 %vm1892_vm0, %v1893_v1 }
 0x19f   : > { %1740 = vmatmul.mubr.f32.gmra.mrb[4].mxu1 %v952_v9 }
 0x1a0   : > { %1746 = vmatprep.mubr.msk.f32.mxu1 %vm1892_vm0, %v1893_v1 }
 0x1a3   : > { %1747 = vmatmul.mubr.f32.vlgmr.msra.gmra.mrb[0].mxu1 %v932_v59 }
 0x1a4   : > { %1749 = vmatprep.mubr.msk.f32.mxu1 %vm1892_vm0, %v1893_v1 }
 0x1a7   : > { %1750 = vmatmul.mubr.f32.gmra.mrb[2].mxu1 %v942_v3 }
 0x1a8   : > { %1752 = vmatprep.mubr.msk.f32.mxu1 %vm1892_vm0, %v1893_v1 }
 0x1ab   : > { %1753 = vmatmul.mubr.f32.gmra.mrb[4].mxu1 %v952_v9 }
 0x276   : > { %v1389_v0 = vpop.f32.mrb[0].mxu1 }
 0x277   : > { %1406 = vst.msk [vmem:[%s123_s10] sm:$0xff] %vm1405_vm13, %v1389_v0  ;;  %v1748_v17 = vpop.f32.mrb[1].mxu1 }
 0x27a   : > { %v1395_v19 = vpop.f32.mrb[2].mxu1 }
 0x27b   : > { %1407 = vst.msk [vmem:[%s123_s10 + $0x8] sm:$0xff] %vm1405_vm13, %v1395_v19  ;;  %v1751_v20 = vpop.f32.mrb[3].mxu1 }
 0x27e   : > { %v1401_v21 = vpop.f32.mrb[4].mxu1 }
 0x27f   : > { %1409 = vst.msk [vmem:[%s123_s10 + $0x10] sm:$0x7] %vm1408_vm14, %v1401_v21  ;;  %v1754_v22 = vpop.f32.mrb[5].mxu1 }
 0x280 PF: > { %s18_s14 = sadd.s32 1, %s1888_s14  }
 0x281   : > { %p15_p9 = scmp.ge.s32.totalorder %s18_s14, 4  }
 0x283   :  { %17 = sbr.rel (!%p15_p9) target bundleno = 16 (0x10), region = 69 }

</bundles_post_ra>
